<compile_context>
chip_gen: v7x
topology: tpu7x:2x2x1
jax: 0.10.0
libtpu: 0.0.40
codegen_flags: <defaults>
</compile_context>

<pallas_src>
import functools

import jax
import jax.numpy as jnp
from jax.experimental import pallas as pl
from jax.experimental.pallas import tpu as pltpu


def _round_up(n: int, m: int) -> int:
    return ((n + m - 1) // m) * m


def _choose_batch_tiling(B: int, cap: int = 512):
    """Pick (TB, B_pad).

    * tiles up to `cap` rows amortize the ~0.35 us per-grid-step overhead
    * at least 2 steps once B >= 128 so the "parallel" axis can be sharded
      across both v7x TensorCores
    * TB = round_up(ceil(B/steps), 8) minimizes padded-row waste instead of
      always padding B up to a multiple of a fixed tile.
    """
    B = max(int(B), 1)
    steps = -(-B // cap)                      # ceil(B / cap)
    if B >= 128 and steps < 2:
        steps = 2
    TB = _round_up(-(-B // steps), 8)         # multiple of 8 (sublane)
    return TB, TB * steps


def _fused_mlp_kernel(*refs, num_layers: int, compute_dtype):
    """Whole MLP in one kernel; activations never leave VMEM/vregs.

    Ref order: x (concat of state/action_parameter, already in compute_dtype),
    then (W_i, b_i) for every layer, then the output.  ReLU on all but the
    last layer (the Q head).
    """
    x_ref = refs[0]
    params = refs[1:1 + 2 * num_layers]
    out_ref = refs[1 + 2 * num_layers]

    h = x_ref[...]
    for li in range(num_layers):
        w_ref = params[2 * li]
        b_ref = params[2 * li + 1]
        # MXU matmul with f32 accumulation; bias-add / ReLU stay in f32 (VPU).
        y = jnp.dot(h, w_ref[...], preferred_element_type=jnp.float32) + b_ref[...]
        if li < num_layers - 1:
            h = jnp.maximum(y, 0.0).astype(compute_dtype)   # hidden layer
        else:
            h = y                                           # Q head: no activation
    out_ref[...] = h.astype(out_ref.dtype)


class QActorPallas:
    """Pallas re-implementation of Q_Actor's forward pass (single fused kernel)."""

    def __init__(self, n_states, n_actions, action_parameter_size,
                 hidden_layers=(100,), key=jax.random.PRNGKey(0),
                 compute_dtype=jnp.bfloat16):
        if hidden_layers is None:
            hidden_layers = [256, 128, 64]
        self.n_states = int(n_states)
        self.n_actions = int(n_actions)
        self.action_parameter_size = int(action_parameter_size)
        self.compute_dtype = compute_dtype
        self.in_dim = self.n_states + self.action_parameter_size

        sizes = [self.in_dim] + list(hidden_layers) + [self.n_actions]
        # Padded output-feature size of every layer (lane-dense, multiple of 128).
        padded_out = [_round_up(s, 128) for s in sizes[1:]]
        self.out_pad = padded_out[-1]

        # ---- unpadded reference params (PyTorch-default-like uniform init) ----
        self.ref_params = []
        for i in range(len(sizes) - 1):
            fan_in, fan_out = sizes[i], sizes[i + 1]
            key, kw, kb = jax.random.split(key, 3)
            bound = 1.0 / float(fan_in) ** 0.5
            w = jax.random.uniform(kw, (fan_in, fan_out), jnp.float32, -bound, bound)
            b = jax.random.uniform(kb, (fan_out,), jnp.float32, -bound, bound)
            self.ref_params.append((w, b))

        # ---- padded kernel params ----
        # Layer 0 keeps its true in-features (matches the concatenated input);
        # deeper layers pad in-features to the previous padded width (padded
        # activation columns are exactly zero, so this is mathematically exact).
        # Out-features are always padded to 128.  Weights are stored in the
        # compute dtype (bf16 by default); biases stay f32 for f32 accumulation.
        self.params = []
        for i, (w, b) in enumerate(self.ref_params):
            fin = self.in_dim if i == 0 else padded_out[i - 1]
            fout = padded_out[i]
            w_p = jnp.pad(w, ((0, fin - w.shape[0]), (0, fout - w.shape[1])))
            b_p = jnp.pad(b, (0, fout - b.shape[0])).reshape(1, fout)
            self.params.append((w_p.astype(compute_dtype), b_p.astype(jnp.float32)))

        # jit once: fuses the concat / cast / pad / output-slice around the
        # pallas_call so they don't cost separate HBM passes.
        self._forward = jax.jit(self._forward_impl)

    # ---- VMEM footprint estimate (used to decide whether to set a limit) ----
    def _estimate_vmem_bytes(self, TB: int) -> int:
        csize = jnp.dtype(self.compute_dtype).itemsize
        total = 2 * TB * self.in_dim * csize            # x tile, double-buffered
        total += 2 * TB * self.out_pad * 4              # out tile, double-buffered
        widest = max(w.shape[1] for w, _ in self.params)
        total += 2 * TB * widest * 4                    # live f32 activations
        for w, b in self.params:                        # resident params (x2 buffers)
            total += 2 * (w.size * w.dtype.itemsize + b.size * b.dtype.itemsize)
        return int(total)

    def _forward_impl(self, state, action_parameter):
        # Match PyTorch: cast to f32, concat along the feature axis.  The concat
        # feeds a single K=(n_states+ap) first-layer matmul in the kernel.
        x = jnp.concatenate([state.astype(jnp.float32),
                             action_parameter.astype(jnp.float32)], axis=1)
        # Pre-cast to the compute dtype: halves activation HBM->VMEM bytes for
        # bf16 and removes per-step VPU casts inside the kernel.
        x = x.astype(self.compute_dtype)

        B = x.shape[0]
        TB, B_pad = _choose_batch_tiling(B)
        if B_pad != B:
            x = jnp.pad(x, ((0, B_pad - B), (0, 0)))

        num_layers = len(self.params)
        kernel = functools.partial(_fused_mlp_kernel,
                                   num_layers=num_layers,
                                   compute_dtype=self.compute_dtype)

        # x is tiled over the batch; weights/biases stay resident (constant
        # index_map -> no re-fetch across grid steps).
        in_specs = [pl.BlockSpec((TB, self.in_dim), lambda i: (i, 0))]
        inputs = [x]
        for (w, b) in self.params:
            in_specs.append(pl.BlockSpec(w.shape, lambda i: (0, 0)))
            in_specs.append(pl.BlockSpec(b.shape, lambda i: (0, 0)))
            inputs.extend([w, b])

        # Explicit VMEM limit only when we approach v5e's 16 MiB scoped default
        # (the binding constraint there); capped below v7x's 64 MiB physical VMEM.
        needed = self._estimate_vmem_bytes(TB)
        vmem_limit = None
        if needed > 12 * 1024 * 1024:
            vmem_limit = int(min(max(2 * needed, 32 << 20), 64 << 20))

        out = pl.pallas_call(
            kernel,
            out_shape=jax.ShapeDtypeStruct((B_pad, self.out_pad), jnp.float32),
            grid_spec=pltpu.PrefetchScalarGridSpec(
                num_scalar_prefetch=0,
                grid=(B_pad // TB,),
                in_specs=in_specs,
                out_specs=pl.BlockSpec((TB, self.out_pad), lambda i: (i, 0)),
            ),
            compiler_params=pltpu.CompilerParams(
                dimension_semantics=("parallel",),
                vmem_limit_bytes=vmem_limit,
            ),
        )(*inputs)

        # Lane-dense 128-wide store inside the kernel; this slice fuses under
        # jit, so it does not add an extra HBM pass.
        return out[:B, :self.n_actions]

    def __call__(self, state, action_parameter):
        return self._forward(state, action_parameter)


if __name__ == "__main__":
    # Small shapes consistent with the module's forward.
    batch = 8
    n_states = 16
    action_parameter_size = 16
    n_actions = 8
    hidden_layers = (100,)   # PyTorch default; padded to 128 inside the wrapper.

    key = jax.random.PRNGKey(0)
    k_state, k_ap, k_params = jax.random.split(key, 3)
    state = jax.random.normal(k_state, (batch, n_states), jnp.float32)
    action_parameter = jax.random.normal(
        k_ap, (batch, action_parameter_size), jnp.float32)

    # Pure-JAX reference of the same (unpadded, f32) forward.
    def reference(model, s, a):
        xr = jnp.concatenate([s, a], axis=1)
        for i, (w, b) in enumerate(model.ref_params):
            y = xr @ w + b
            xr = jnp.maximum(y, 0.0) if i < len(model.ref_params) - 1 else y
        return xr

    # (1) f32 compute path: tight numerical check.
    model_f32 = QActorPallas(n_states, n_actions, action_parameter_size,
                             hidden_layers=hidden_layers, key=k_params,
                             compute_dtype=jnp.float32)
    q = jax.block_until_ready(model_f32(state, action_parameter))
    assert q.shape == (batch, n_actions)
    assert jnp.allclose(q, reference(model_f32, state, action_parameter),
                        atol=1e-4, rtol=1e-4)

    # (2) Multi-step grid path (B >= 128 -> two "parallel" grid steps).
    big_b = 160
    kb1, kb2 = jax.random.split(jax.random.PRNGKey(1))
    state_b = jax.random.normal(kb1, (big_b, n_states), jnp.float32)
    ap_b = jax.random.normal(kb2, (big_b, action_parameter_size), jnp.float32)
    q_b = jax.block_until_ready(model_f32(state_b, ap_b))
    assert q_b.shape == (big_b, n_actions)
    assert jnp.allclose(q_b, reference(model_f32, state_b, ap_b),
                        atol=1e-4, rtol=1e-4)

    # (3) Default bf16-operand / f32-accumulation path (MXU fast path on
    #     v5e/v6e/v7x): loose tolerance since weights/activations are bf16.
    model_bf16 = QActorPallas(n_states, n_actions, action_parameter_size,
                              hidden_layers=hidden_layers, key=k_params)
    q_bf = jax.block_until_ready(model_bf16(state, action_parameter))
    assert q_bf.shape == (batch, n_actions)
    assert bool(jnp.all(jnp.isfinite(q_bf)))
    assert jnp.allclose(q_bf, reference(model_bf16, state, action_parameter),
                        atol=1e-1, rtol=1e-1)

    print("KERNEL_OK")
</pallas_src>

<mosaic_0001>
module attributes {stable_mosaic.version = 11 : i64} {
  func.func @_fused_mlp_kernel(%arg0: i32, %arg1: memref<8x32xf32, #tpu.memory_space<vmem>>, %arg2: memref<32x128xf32, #tpu.memory_space<vmem>>, %arg3: memref<1x128xf32, #tpu.memory_space<vmem>>, %arg4: memref<128x128xf32, #tpu.memory_space<vmem>>, %arg5: memref<1x128xf32, #tpu.memory_space<vmem>>, %arg6: memref<8x128xf32, #tpu.memory_space<vmem>>) attributes {dimension_semantics = [#tpu.dimension_semantics<parallel>], iteration_bounds = array<i64: 1>, scalar_prefetch = 0 : i64, scratch_operands = 0 : i64, tpu.core_type = #tpu.core_type<tc>, window_params = [{transform_indices = @transform_0, window_bounds = array<i64: 8, 32>}, {pipeline_mode = #tpu.pipeline_mode<synchronous>, transform_indices = @transform_1, window_bounds = array<i64: 32, 128>}, {pipeline_mode = #tpu.pipeline_mode<synchronous>, transform_indices = @transform_2, window_bounds = array<i64: 1, 128>}, {pipeline_mode = #tpu.pipeline_mode<synchronous>, transform_indices = @transform_3, window_bounds = array<i64: 128, 128>}, {pipeline_mode = #tpu.pipeline_mode<synchronous>, transform_indices = @transform_4, window_bounds = array<i64: 1, 128>}, {transform_indices = @transform_5, window_bounds = array<i64: 8, 128>}]} {
    %c0 = arith.constant 0 : index
    %c0_0 = arith.constant 0 : index
    %0 = vector.load %arg1[%c0, %c0_0] : memref<8x32xf32, #tpu.memory_space<vmem>>, vector<8x32xf32>
    %c0_1 = arith.constant 0 : index
    %c0_2 = arith.constant 0 : index
    %1 = vector.load %arg2[%c0_1, %c0_2] : memref<32x128xf32, #tpu.memory_space<vmem>>, vector<32x128xf32>
    %cst = arith.constant dense<0.000000e+00> : vector<8x128xf32>
    %2 = tpu.matmul %0, %1, %cst {dimension_numbers = #tpu.dot_dimension_numbers<[1], [0], [0], [1], [0, 0, 1, 1], [], []>} : vector<8x32xf32>, vector<32x128xf32>, vector<8x128xf32> -> vector<8x128xf32>
    %c0_3 = arith.constant 0 : index
    %c0_4 = arith.constant 0 : index
    %3 = vector.load %arg3[%c0_3, %c0_4] : memref<1x128xf32, #tpu.memory_space<vmem>>, vector<1x128xf32>
    %4 = vector.broadcast %3 : vector<1x128xf32> to vector<8x128xf32>
    %5 = arith.addf %2, %4 : vector<8x128xf32>
    %cst_5 = arith.constant 0.000000e+00 : f32
    %6 = vector.broadcast %cst_5 : f32 to vector<8x128xf32>
    %7 = arith.maximumf %5, %6 : vector<8x128xf32>
    %c0_6 = arith.constant 0 : index
    %c0_7 = arith.constant 0 : index
    %8 = vector.load %arg4[%c0_6, %c0_7] : memref<128x128xf32, #tpu.memory_space<vmem>>, vector<128x128xf32>
    %cst_8 = arith.constant dense<0.000000e+00> : vector<8x128xf32>
    %9 = tpu.matmul %7, %8, %cst_8 {dimension_numbers = #tpu.dot_dimension_numbers<[1], [0], [0], [1], [0, 0, 1, 1], [], []>} : vector<8x128xf32>, vector<128x128xf32>, vector<8x128xf32> -> vector<8x128xf32>
    %c0_9 = arith.constant 0 : index
    %c0_10 = arith.constant 0 : index
    %10 = vector.load %arg5[%c0_9, %c0_10] : memref<1x128xf32, #tpu.memory_space<vmem>>, vector<1x128xf32>
    %11 = vector.broadcast %10 : vector<1x128xf32> to vector<8x128xf32>
    %12 = arith.addf %9, %11 : vector<8x128xf32>
    %c0_11 = arith.constant 0 : index
    %c0_12 = arith.constant 0 : index
    %13 = vector.load %arg6[%c0_11, %c0_12] : memref<8x128xf32, #tpu.memory_space<vmem>>, vector<8x128xf32>
    tpu.vector_store %arg6[%c0_11, %c0_12], %12 {strides = array<i32>} : memref<8x128xf32, #tpu.memory_space<vmem>>, vector<8x128xf32>,
    return
  }
  func.func @transform_0(%arg0: i32) -> (i32, i32) {
    %c0_i32 = arith.constant 0 : i32
    %c0_i32_0 = arith.constant 0 : i32
    return %arg0, %c0_i32 : i32, i32
  }
  func.func @transform_1(%arg0: i32) -> (i32, i32) {
    %c0_i32 = arith.constant 0 : i32
    %c0_i32_0 = arith.constant 0 : i32
    %c0_i32_1 = arith.constant 0 : i32
    return %c0_i32, %c0_i32_0 : i32, i32
  }
  func.func @transform_2(%arg0: i32) -> (i32, i32) {
    %c0_i32 = arith.constant 0 : i32
    %c0_i32_0 = arith.constant 0 : i32
    %c0_i32_1 = arith.constant 0 : i32
    return %c0_i32, %c0_i32_0 : i32, i32
  }
  func.func @transform_3(%arg0: i32) -> (i32, i32) {
    %c0_i32 = arith.constant 0 : i32
    %c0_i32_0 = arith.constant 0 : i32
    %c0_i32_1 = arith.constant 0 : i32
    return %c0_i32, %c0_i32_0 : i32, i32
  }
  func.func @transform_4(%arg0: i32) -> (i32, i32) {
    %c0_i32 = arith.constant 0 : i32
    %c0_i32_0 = arith.constant 0 : i32
    %c0_i32_1 = arith.constant 0 : i32
    return %c0_i32, %c0_i32_0 : i32, i32
  }
  func.func @transform_5(%arg0: i32) -> (i32, i32) {
    %c0_i32 = arith.constant 0 : i32
    %c0_i32_0 = arith.constant 0 : i32
    return %arg0, %c0_i32 : i32, i32
  }
}

</mosaic_0001>

<bundles_post_ra>
// kernel: _forward_impl.1
= control target key start
LH: loop header
LB: loop body
LE: loop exit
PB: predicated region body
PF: predicated region fallthrough
CT: control target
= control target key end

     0   :  { %10 = vsyncpa [#allocation3], 0  ;;  %s510_s0 = inlined_call_operand.vmem [shape: f32[8,32], index: 0, kind: input, shape index: {}]   ;;  %s511_s1 = inlined_call_operand.hbm [shape: f32[32,128], index: 1, kind: input, shape index: {}]   ;;  %s512_s2 = inlined_call_operand.vmem [shape: f32[1,128], index: 2, kind: input, shape index: {}]   ;;  %s513_s3 = inlined_call_operand.hbm [shape: f32[128,128], index: 3, kind: input, shape index: {}]   ;;  %s514_s4 = inlined_call_operand.vmem [shape: f32[1,128], index: 4, kind: input, shape index: {}]   ;;  %s515_s5 = inlined_call_operand.hbm [shape: f32[8,128], index: 5, kind: output, shape index: {}]  }
   0x1   :  { %11 = vsyncpa [#allocation6], 0 }
   0x2   :  { %12 = vsyncpa [#allocation4], 0  ;;  %s427_s18 = smov [#allocation2]   ;;  %s355_s22 = scalar_lea.hbm %s511_s1, 512 }
   0x3   :  { %s20_s19 = sshll.u32 %s427_s18, 4  ;;  %p356_p0 = scmp.ne.s32.totalorder %s511_s1, %s355_s22  ;;  %s21_s19 = int_to_ptr.vmem [resolvable:$true] %s20_s19 }
   0x4   :  { %p359_p1 = scmp.lt.u32.totalorder %s355_s22, %s511_s1 }
   0x6   :  { %p361_p2 = pnand %p359_p1, %p356_p0 }
   0x8   :  { %364 = shalt.err (!%p361_p2)
}
   0x9   :  { %s365_s27 = scalar_lea.vmem %s21_s19, 512  ;;  %p370_p4 = scmp.lt.s32.totalorder %s21_s19, %s21_s19 }
   0xa   :  { %p366_p3 = scmp.ne.s32.totalorder %s21_s19, %s365_s27  ;;  %p371_p5 = scmp.lt.s32.totalorder %s365_s27, %s365_s27 }
   0xc   :  { %p372_p6 = por %p371_p5, %p370_p4 }
   0xe   :  { %p373_p7 = pnand %p372_p6, %p366_p3 }
  0x10   :  { %376 = shalt.err (!%p373_p7)
}
  0x11   :  { %s428_s28 = smov 128   ;;  %s429_s29 = smov 8  }
  0x12   :  { %26 = dma.hbm_to_vmem [thread:$0]  %s511_s1, 512, %s21_s19, [#allocation3], %s428_s28, %s428_s28, %s429_s29  }
  0x13   :  { %s430_s7 = smov [#allocation5]   ;;  %s377_s11 = scalar_lea.hbm %s513_s3, 2048 }
  0x14   :  { %s34_s8 = sshll.u32 %s430_s7, 4  ;;  %p378_p8 = scmp.ne.s32.totalorder %s513_s3, %s377_s11  ;;  %s35_s8 = int_to_ptr.vmem [resolvable:$true] %s34_s8 }
  0x15   :  { %p381_p9 = scmp.lt.u32.totalorder %s377_s11, %s513_s3 }
  0x17   :  { %p383_p10 = pnand %p381_p9, %p378_p8 }
  0x19   :  { %386 = shalt.err (!%p383_p10)
}
  0x1a   :  { %s387_s16 = scalar_lea.vmem %s35_s8, 2048  ;;  %p392_p12 = scmp.lt.s32.totalorder %s35_s8, %s35_s8 }
  0x1b   :  { %p388_p11 = scmp.ne.s32.totalorder %s35_s8, %s387_s16  ;;  %p393_p13 = scmp.lt.s32.totalorder %s387_s16, %s387_s16 }
  0x1d   :  { %p394_p0 = por %p393_p13, %p392_p12 }
  0x1f   :  { %p395_p1 = pnand %p394_p0, %p388_p11 }
  0x21   :  { %398 = shalt.err (!%p395_p1)
}
  0x22   :  { %40 = dma.hbm_to_vmem [thread:$0]  %s513_s3, 2048, %s35_s8, [#allocation6], %s428_s28, %s428_s28, %s429_s29  }
  0x23   :  { %421 = dma.done.wait [#allocation3], 512  }
  0x24   :  { %422 = vsyncadd [#allocation3], 4294966784 }
  0x25   :  { %423 = dma.done.wait [#allocation6], 2048  }
  0x26   :  { %424 = vsyncadd [#allocation6], 4294965248  ;;  %v431_v0 = vmov 0.0|0.0   ;;  %vm432_vm0 = vmmov 0   ;;  %v433_v1 = vmov 0.0   ;;  %v50_v2 = vld [vmem:[#allocation2] sm:$0xff] }
  0x27   :  { %317 = vmatprep.subr.bf16.mxu0 %v431_v0  ;;  %279 = vmatprep.mubr.msk.f32.mxu0 %vm432_vm0, %v433_v1  ;;  %v51_v3 = vld [vmem:[#allocation2 + $0x8] sm:$0xff]  ;;  %v52_v4 = vld [vmem:[#allocation2 + $0x10] sm:$0xff]  ;;  %v53_v6 = vld [vmem:[#allocation2 + $0x18] sm:$0xff]  ;;  %vm61_vm1 = vcmask 261120   ;;  %s434_s22 = smov [#allocation7]  }
  0x28   :  { %323 = vmatprep.subr.bf16.mxu1 %v431_v0  ;;  %314 = vmatprep.mubr.msk.f32.mxu1 %vm432_vm0, %v433_v1  ;;  %v318_v5 = vpack.c.bf16 %v51_v3, %v50_v2  ;;  %v136_v7 = vld [vmem:[#allocation5] sm:$0xff]  ;;  %v137_v8 = vld [vmem:[#allocation5 + $0x8] sm:$0xff]  ;;  %v138_v9 = vld [vmem:[#allocation5 + $0x10] sm:$0xff]  ;;  %v321_v11 = vpack.c.bf16 %v53_v6, %v52_v4  ;;  %s236_s23 = sshll.u32 %s434_s22, 4  ;;  %s237_s23 = int_to_ptr.vmem [resolvable:$true] %s236_s23 }
  0x29   :  { %v139_v10 = vld [vmem:[#allocation5 + $0x18] sm:$0xff]  ;;  %v324_v12 = vpack.c.bf16 %v137_v8, %v136_v7  ;;  %v140_v14 = vld [vmem:[#allocation5 + $0x20] sm:$0xff]  ;;  %v141_v15 = vld [vmem:[#allocation5 + $0x28] sm:$0xff]  ;;  %s399_s24 = scalar_lea.vmem %s237_s23, 128  ;;  %p404_p3 = scmp.lt.s32.totalorder %s237_s23, %s237_s23 }
  0x2a   :  { %319 = vmatpush3.bf16.msra.mxu0 %v318_v5  ;;  %v327_v13 = vpack.c.bf16 %v139_v10, %v138_v9  ;;  %v49_v16 = vld [vmem:[%s510_s0] sm:$0xff]  ;;  %v330_v17 = vpack.c.bf16 %v141_v15, %v140_v14  ;;  %v142_v18 = vld [vmem:[#allocation5 + $0x30] sm:$0xff]  ;;  %v144_v21 = vld [vmem:[#allocation5 + $0x40] sm:$0xff]  ;;  %p400_p2 = scmp.ne.s32.totalorder %s237_s23, %s399_s24  ;;  %p405_p4 = scmp.lt.s32.totalorder %s399_s24, %s399_s24 }
  0x2b   :  { %320 = vmatprep.subr.bf16.mxu0 %v431_v0  ;;  %325 = vmatpush3.bf16.msra.mxu1 %v324_v12  ;;  %v143_v19 = vld [vmem:[#allocation5 + $0x38] sm:$0xff]  ;;  %v145_v22 = vld [vmem:[#allocation5 + $0x48] sm:$0xff]  ;;  %v146_v24 = vld [vmem:[#allocation5 + $0x50] sm:$0xff] }
  0x2c   :  { %326 = vmatprep.subr.bf16.mxu1 %v431_v0  ;;  %v333_v20 = vpack.c.bf16 %v143_v19, %v142_v18  ;;  %v336_v23 = vpack.c.bf16 %v145_v22, %v144_v21  ;;  %v147_v25 = vld [vmem:[#allocation5 + $0x58] sm:$0xff]  ;;  %v148_v27 = vld [vmem:[#allocation5 + $0x60] sm:$0xff]  ;;  %v149_v28 = vld [vmem:[#allocation5 + $0x68] sm:$0xff]  ;;  %p406_p5 = por %p405_p4, %p404_p3 }
  0x2d   :  { %v339_v26 = vpack.c.bf16 %v147_v25, %v146_v24  ;;  %v342_v29 = vpack.c.bf16 %v149_v28, %v148_v27  ;;  %v150_v30 = vld [vmem:[#allocation5 + $0x70] sm:$0xff]  ;;  %v151_v31 = vld [vmem:[#allocation5 + $0x78] sm:$0xff] }
  0x2e   :  { %322 = vmatpush3.bf16.msra.mxu0 %v321_v11  ;;  %v345_v32 = vpack.c.bf16 %v151_v31, %v150_v30  ;;  %v246_v33 = vld [vmem:[%s512_s2] ss:$0 sm:$0xff]  ;;  %p407_p6 = pnand %p406_p5, %p400_p2 }
  0x2f   :  { %328 = vmatpush3.bf16.msra.mxu1 %v327_v13  ;;  %v248_v38 = vld [vmem:[%s514_s4] ss:$0 sm:$0xff] }
  0x30   :  { %329 = vmatprep.subr.bf16.mxu1 %v431_v0 }
  0x31   :  { %280 = vmatmul.mubr.msk.f32.vlgmr.msra.gmra.mrb[0].mxu0 %vm61_vm1, %v49_v16 }
  0x33   :  { %331 = vmatpush3.bf16.msra.mxu1 %v330_v17 }
  0x34   :  { %332 = vmatprep.subr.bf16.mxu1 %v431_v0 }
  0x37   :  { %334 = vmatpush3.bf16.msra.mxu1 %v333_v20 }
  0x38   :  { %335 = vmatprep.subr.bf16.mxu1 %v431_v0 }
  0x3b   :  { %337 = vmatpush3.bf16.msra.mxu1 %v336_v23 }
  0x3c   :  { %338 = vmatprep.subr.bf16.mxu1 %v431_v0 }
  0x3f   :  { %340 = vmatpush3.bf16.msra.mxu1 %v339_v26 }
  0x40   :  { %341 = vmatprep.subr.bf16.mxu1 %v431_v0 }
  0x43   :  { %343 = vmatpush3.bf16.msra.mxu1 %v342_v29 }
  0x44   :  { %344 = vmatprep.subr.bf16.mxu1 %v431_v0 }
  0x47   :  { %346 = vmatpush3.bf16.msra.mxu1 %v345_v32 }
 0x104   :  { %v131_v34 = vpop.f32.mrb[0].mxu0 }
 0x105   :  { %v132_v35 = vadd.f32 %v246_v33, %v131_v34  ;;  %v281_v36 = vpop.f32.mrb[1].mxu0 }
 0x107   :  { %v135_v37 = vmax.f32 %v132_v35, 0.0 }
 0x109   :  { %315 = vmatmul.mubr.f32.vlgmr.msra.gmra.mrb[0].mxu1 %v135_v37 }
 0x1dc   :  { %v225_v39 = vpop.f32.mrb[0].mxu1 }
 0x1dd   :  { %v226_v40 = vadd.f32 %v248_v38, %v225_v39  ;;  %v316_v41 = vpop.f32.mrb[1].mxu1 }
 0x1df   :  { %229 = vst [vmem:[#allocation7] sm:$0xff] %v226_v40 }
 0x1e0   :  { %410 = shalt.err (!%p407_p6)
}
 0x1e1   :  { %s411_s26 = scalar_lea.hbm %s515_s5, 128 }
 0x1e2   :  { %p412_p7 = scmp.ne.s32.totalorder %s515_s5, %s411_s26  ;;  %p415_p8 = scmp.lt.u32.totalorder %s411_s26, %s515_s5 }
 0x1e4   :  { %p417_p9 = pnand %p415_p8, %p412_p7 }
 0x1e6   :  { %420 = shalt.err (!%p417_p9)
}
 0x1e7   :  { %239 = dma.vmem_to_hbm [thread:$0]  %s237_s23, 128, %s515_s5, [#allocation4]  }
 0x1e8   :  { %425 = dma.done.wait [#allocation4], 128  }
 0x1e9   :  { %426 = vsyncadd [#allocation4], 4294967168 }
 0x1ea   :  { %243 = vsyncpa [#allocation3], 1 }
 0x1eb   :  { %244 = vsyncpa [#allocation6], 1 }
 0x1ec   :  { %245 = vsyncpa [#allocation4], 1 }

</bundles_post_ra>
